<compile_context>
chip_gen: v7x
topology: tpu7x:2x2x1
jax: 0.10.0
libtpu: 0.0.40
codegen_flags: <defaults>
</compile_context>

<pallas_src>
import math
from functools import partial

import jax
import jax.numpy as jnp
from jax.experimental import pallas as pl
from jax.experimental.pallas import tpu as pltpu

LANE = 128      # lane width of a vreg (last dim)
SUBLANE = 8     # sublane count of a vreg (second-to-last dim)
MAX_TILE_B = 512


def _round_up(n, m):
    return ((n + m - 1) // m) * m


# ----------------------------------------------------------------------------
# Fused kernel body
#   grid = (batch_tiles, num_blocks); axis 0 "parallel", axis 1 "arbitrary".
#   Per-block weights are streamed along axis 1; h is carried in VMEM scratch.
# ----------------------------------------------------------------------------
def fused_resnet_kernel(x_ref, w1r_ref, b1r_ref, w2_ref, b2_ref,
                        wo_ref, bo_ref, o_ref, h_ref):
    blk = pl.program_id(1)
    n_blk = pl.num_programs(1)

    # First residual block of this batch tile: load the input into the carry.
    @pl.when(blk == 0)
    def _():
        h_ref[...] = x_ref[...]

    h = h_ref[...]                      # (TILE_B, P) f32
    w1r = w1r_ref[0]                    # (P, 2P)  alpha*fc1 || alpha*(1-beta)*fc_res
    b1r = b1r_ref[0]                    # (1, 2P)
    w2 = w2_ref[0]                      # (P, P)   alpha*beta*fc2
    b2 = b2_ref[0]                      # (1, P)
    P = w2.shape[0]

    # One MXU matmul covers both the fc1 branch and the residual branch.
    z = jnp.dot(h.astype(w1r.dtype), w1r, preferred_element_type=jnp.float32) + b1r
    a = jnp.tanh(z[:, :P])              # tanh(alpha*(fc1(h)))
    h_new = jnp.tanh(                   # tanh(alpha*(beta*fc2(a) + (1-beta)*fc_res(h)))
        jnp.dot(a.astype(w2.dtype), w2, preferred_element_type=jnp.float32)
        + b2 + z[:, P:])
    h_ref[...] = h_new

    # After the last block: output linear layer.
    @pl.when(blk == n_blk - 1)
    def _():
        wo = wo_ref[...]
        o_ref[...] = (jnp.dot(h_new.astype(wo.dtype), wo,
                              preferred_element_type=jnp.float32)
                      + bo_ref[...])


# ----------------------------------------------------------------------------
# Wrapper
# ----------------------------------------------------------------------------
def adaptive_resnet_forward(x, fused_params, input_size, output_size):
    """x: (B, input_size) f32 -> (B, output_size) f32."""
    W1R, B1R, W2, B2, WO, BO = fused_params
    num_blocks, P, _ = W2.shape
    out_pad = WO.shape[1]
    assert num_blocks >= 1

    B = x.shape[0]
    if B <= MAX_TILE_B:
        tile_b = max(_round_up(B, SUBLANE), SUBLANE)
    else:
        tile_b = MAX_TILE_B
    B_pad = _round_up(B, tile_b)

    x_pad = jnp.zeros((B_pad, P), jnp.float32).at[:B, :input_size].set(x)

    # VMEM budget: streamed per-block weights (x2 double buffer) + resident
    # activations/output-layer weights + h carry scratch.  Clamp to [32, 64] MiB
    # so it is valid on all of v5e/v6e/v7x.
    wsz = jnp.dtype(W2.dtype).itemsize
    stream_bytes = 2 * (P * 2 * P * wsz + 2 * P * 4 + P * P * wsz + P * 4)
    resident_bytes = (2 * tile_b * P * 4          # x tile (double buffered)
                      + tile_b * P * 4            # h carry scratch
                      + 2 * tile_b * out_pad * 4  # output tile
                      + P * out_pad * wsz + out_pad * 4)  # output layer weights
    vmem_limit = int(min(max(int(1.25 * (stream_bytes + resident_bytes)) + (8 << 20),
                             32 << 20), 64 << 20))

    flops = int(2 * B_pad * num_blocks * (P * 2 * P + P * P) + 2 * B_pad * P * out_pad)
    transcendentals = int(2 * B_pad * num_blocks * P)
    bytes_accessed = int(sum(int(a.nbytes) for a in (W1R, B1R, W2, B2, WO, BO))
                         + int(x_pad.nbytes) + B_pad * out_pad * 4)

    y_pad = pl.pallas_call(
        fused_resnet_kernel,
        out_shape=jax.ShapeDtypeStruct((B_pad, out_pad), jnp.float32),
        grid_spec=pltpu.PrefetchScalarGridSpec(
            num_scalar_prefetch=0,
            grid=(B_pad // tile_b, num_blocks),
            in_specs=[
                pl.BlockSpec((tile_b, P), lambda i, b: (i, 0)),        # x tile
                pl.BlockSpec((1, P, 2 * P), lambda i, b: (b, 0, 0)),   # fc1||res W (streamed)
                pl.BlockSpec((1, 1, 2 * P), lambda i, b: (b, 0, 0)),   # fc1||res bias
                pl.BlockSpec((1, P, P), lambda i, b: (b, 0, 0)),       # fc2 W (streamed)
                pl.BlockSpec((1, 1, P), lambda i, b: (b, 0, 0)),       # fc2 bias
                pl.BlockSpec((P, out_pad), lambda i, b: (0, 0)),       # output layer W
                pl.BlockSpec((1, out_pad), lambda i, b: (0, 0)),       # output layer bias
            ],
            out_specs=pl.BlockSpec((tile_b, out_pad), lambda i, b: (i, 0)),
            scratch_shapes=[pltpu.VMEM((tile_b, P), jnp.float32)],     # h carry
        ),
        compiler_params=pltpu.CompilerParams(
            dimension_semantics=("parallel", "arbitrary"),
            vmem_limit_bytes=vmem_limit),
        cost_estimate=pl.CostEstimate(flops=flops,
                                      transcendentals=transcendentals,
                                      bytes_accessed=bytes_accessed),
    )(x_pad, W1R, B1R, W2, B2, WO, BO)

    return y_pad[:B, :output_size]


# ----------------------------------------------------------------------------
# Parameter init (mirrors the torch module)
# ----------------------------------------------------------------------------
def _xavier_uniform(key, fan_in, fan_out):
    limit = math.sqrt(6.0 / (fan_in + fan_out))
    # Stored as (in, out) == transposed torch weight; xavier limit is symmetric.
    return jax.random.uniform(key, (fan_in, fan_out), jnp.float32, -limit, limit)


def _linear_bias(key, fan_in, fan_out):
    # torch.nn.Linear default bias init: U(-1/sqrt(fan_in), 1/sqrt(fan_in))
    bound = 1.0 / math.sqrt(fan_in)
    return jax.random.uniform(key, (1, fan_out), jnp.float32, -bound, bound)


def init_adaptive_resnet(key, input_size, output_size, residual_blocks_neurons):
    blocks = []
    prev = input_size
    for neurons in residual_blocks_neurons:
        key, k1, k2, k3, k4, k5, k6 = jax.random.split(key, 7)
        w1 = _xavier_uniform(k1, prev, neurons)
        b1 = _linear_bias(k2, prev, neurons)
        w2 = _xavier_uniform(k3, neurons, neurons)
        b2 = _linear_bias(k4, neurons, neurons)
        wr = _xavier_uniform(k5, prev, neurons)
        br = _linear_bias(k6, prev, neurons)
        alpha = jnp.float32(0.9)   # AdaptiveActivation.alpha
        beta = jnp.float32(0.9)    # ResidualBlock.beta
        blocks.append((w1, b1, w2, b2, wr, br, alpha, beta))
        prev = neurons
    key, k1, k2 = jax.random.split(key, 3)
    wo = _xavier_uniform(k1, prev, output_size)
    bo = _linear_bias(k2, prev, output_size)
    return blocks, (wo, bo)


# ----------------------------------------------------------------------------
# Packing: pad all feature dims to one 128-lane-multiple width P, stack per-block
# weights for streaming, and fold alpha / clip(beta) into the weights.
# ----------------------------------------------------------------------------
def pack_fused_params(blocks, out_params, weight_dtype=jnp.float32):
    num_blocks = len(blocks)
    P = LANE
    for (w1, *_rest) in blocks:
        fi, fo = w1.shape
        P = max(P, _round_up(fi, LANE), _round_up(fo, LANE))

    W1R = jnp.zeros((num_blocks, P, 2 * P), jnp.float32)
    B1R = jnp.zeros((num_blocks, 1, 2 * P), jnp.float32)
    W2 = jnp.zeros((num_blocks, P, P), jnp.float32)
    B2 = jnp.zeros((num_blocks, 1, P), jnp.float32)

    for idx, (w1, b1, w2, b2, wr, br, alpha, beta) in enumerate(blocks):
        fi, fo = w1.shape
        bc = jnp.clip(beta, 0.01, 1.0)
        # Fold: fc1 half * alpha, fc2 * alpha*beta, residual half * alpha*(1-beta).
        W1R = (W1R.at[idx, :fi, :fo].set(alpha * w1)
                   .at[idx, :fi, P:P + fo].set(alpha * (1.0 - bc) * wr))
        B1R = (B1R.at[idx, 0, :fo].set(alpha * b1[0])
                   .at[idx, 0, P:P + fo].set(alpha * (1.0 - bc) * br[0]))
        W2 = W2.at[idx, :fo, :fo].set(alpha * bc * w2)
        B2 = B2.at[idx, 0, :fo].set(alpha * bc * b2[0])

    wo, bo = out_params
    fi, fo = wo.shape
    out_pad = _round_up(fo, LANE)
    WO = jnp.zeros((P, out_pad), jnp.float32).at[:fi, :fo].set(wo)
    BO = jnp.zeros((1, out_pad), jnp.float32).at[:, :fo].set(bo[0])

    # Optional bf16 weight packing (biases stay f32; accumulation stays f32).
    W1R = W1R.astype(weight_dtype)
    W2 = W2.astype(weight_dtype)
    WO = WO.astype(weight_dtype)
    return W1R, B1R, W2, B2, WO, BO


# ----------------------------------------------------------------------------
# Reference (pure JAX, unpadded, unfolded) for a sanity check
# ----------------------------------------------------------------------------
def reference_forward(x, blocks, out_params):
    h = x
    for (w1, b1, w2, b2, wr, br, alpha, beta) in blocks:
        bc = jnp.clip(beta, 0.01, 1.0)
        a = jnp.tanh(alpha * (h @ w1 + b1))
        a2 = a @ w2 + b2
        res = h @ wr + br
        h = jnp.tanh(alpha * (bc * a2 + (1.0 - bc) * res))
    wo, bo = out_params
    return h @ wo + bo


if __name__ == "__main__":
    key = jax.random.PRNGKey(0)
    kx, kp = jax.random.split(key)

    batch = 8
    input_size = 16
    output_size = 4
    residual_blocks_neurons = [32, 32]

    x = jax.random.normal(kx, (batch, input_size), dtype=jnp.float32)
    blocks, out_params = init_adaptive_resnet(
        kp, input_size, output_size, residual_blocks_neurons)
    fused_params = pack_fused_params(blocks, out_params)  # f32 weights by default

    fwd = jax.jit(partial(adaptive_resnet_forward,
                          input_size=input_size, output_size=output_size))
    y = fwd(x, fused_params)
    y = jax.block_until_ready(y)

    y_ref = reference_forward(x, blocks, out_params)
    assert y.shape == (batch, output_size)
    # alpha/beta are folded into the weights -> a few-ulp association difference
    # vs the unfolded reference, hence the slightly loosened tolerance.
    assert jnp.allclose(y, y_ref, atol=1e-4, rtol=1e-4), \
        float(jnp.max(jnp.abs(y - y_ref)))

    print("KERNEL_OK")
</pallas_src>

<mosaic_0001>
module attributes {stable_mosaic.version = 11 : i64} {
  func.func @fused_resnet_kernel(%arg0: i32, %arg1: i32, %arg2: memref<8x128xf32, #tpu.memory_space<vmem>>, %arg3: memref<1x128x256xf32, #tpu.memory_space<vmem>>, %arg4: memref<1x1x256xf32, #tpu.memory_space<vmem>>, %arg5: memref<1x128x128xf32, #tpu.memory_space<vmem>>, %arg6: memref<1x1x128xf32, #tpu.memory_space<vmem>>, %arg7: memref<128x128xf32, #tpu.memory_space<vmem>>, %arg8: memref<1x128xf32, #tpu.memory_space<vmem>>, %arg9: memref<8x128xf32, #tpu.memory_space<vmem>>, %arg10: memref<8x128xf32, #tpu.memory_space<vmem>>) attributes {dimension_semantics = [#tpu.dimension_semantics<parallel>, #tpu.dimension_semantics<arbitrary>], iteration_bounds = array<i64: 1, 2>, scalar_prefetch = 0 : i64, scratch_operands = 1 : i64, tpu.core_type = #tpu.core_type<tc>, window_params = [{transform_indices = @transform_0, window_bounds = array<i64: 8, 128>}, {transform_indices = @transform_1, window_bounds = array<i64: 1, 128, 256>}, {transform_indices = @transform_2, window_bounds = array<i64: 1, 1, 256>}, {transform_indices = @transform_3, window_bounds = array<i64: 1, 128, 128>}, {transform_indices = @transform_4, window_bounds = array<i64: 1, 1, 128>}, {pipeline_mode = #tpu.pipeline_mode<synchronous>, transform_indices = @transform_5, window_bounds = array<i64: 128, 128>}, {pipeline_mode = #tpu.pipeline_mode<synchronous>, transform_indices = @transform_6, window_bounds = array<i64: 1, 128>}, {transform_indices = @transform_7, window_bounds = array<i64: 8, 128>}]} {
    %c0_i32 = arith.constant 0 : i32
    %0 = arith.cmpi eq, %arg1, %c0_i32 : i32
    %1 = arith.extui %0 : i1 to i32
    %c0_i32_0 = arith.constant 0 : i32
    %2 = arith.cmpi ne, %1, %c0_i32_0 : i32
    scf.if %2 {
      %c0_18 = arith.constant 0 : index
      %c0_19 = arith.constant 0 : index
      %27 = vector.load %arg2[%c0_18, %c0_19] : memref<8x128xf32, #tpu.memory_space<vmem>>, vector<8x128xf32>
      %c0_20 = arith.constant 0 : index
      %c0_21 = arith.constant 0 : index
      %28 = vector.load %arg10[%c0_20, %c0_21] : memref<8x128xf32, #tpu.memory_space<vmem>>, vector<8x128xf32>
      tpu.vector_store %arg10[%c0_20, %c0_21], %27 {strides = array<i32>} : memref<8x128xf32, #tpu.memory_space<vmem>>, vector<8x128xf32>,
    } else {
    }
    %c0 = arith.constant 0 : index
    %c0_1 = arith.constant 0 : index
    %3 = vector.load %arg10[%c0, %c0_1] : memref<8x128xf32, #tpu.memory_space<vmem>>, vector<8x128xf32>
    %c0_2 = arith.constant 0 : index
    %c0_3 = arith.constant 0 : index
    %c0_4 = arith.constant 0 : index
    %4 = vector.load %arg3[%c0_2, %c0_3, %c0_4] : memref<1x128x256xf32, #tpu.memory_space<vmem>>, vector<1x128x256xf32>
    %5 = vector.shape_cast %4 : vector<1x128x256xf32> to vector<128x256xf32>
    %c0_5 = arith.constant 0 : index
    %c0_6 = arith.constant 0 : index
    %c0_7 = arith.constant 0 : index
    %6 = vector.load %arg4[%c0_5, %c0_6, %c0_7] : memref<1x1x256xf32, #tpu.memory_space<vmem>>, vector<1x1x256xf32>
    %7 = vector.shape_cast %6 : vector<1x1x256xf32> to vector<1x256xf32>
    %c0_8 = arith.constant 0 : index
    %c0_9 = arith.constant 0 : index
    %c0_10 = arith.constant 0 : index
    %8 = vector.load %arg5[%c0_8, %c0_9, %c0_10] : memref<1x128x128xf32, #tpu.memory_space<vmem>>, vector<1x128x128xf32>
    %9 = vector.shape_cast %8 : vector<1x128x128xf32> to vector<128x128xf32>
    %c0_11 = arith.constant 0 : index
    %c0_12 = arith.constant 0 : index
    %c0_13 = arith.constant 0 : index
    %10 = vector.load %arg6[%c0_11, %c0_12, %c0_13] : memref<1x1x128xf32, #tpu.memory_space<vmem>>, vector<1x1x128xf32>
    %11 = vector.shape_cast %10 : vector<1x1x128xf32> to vector<1x128xf32>
    %cst = arith.constant dense<0.000000e+00> : vector<8x256xf32>
    %12 = tpu.matmul %3, %5, %cst {dimension_numbers = #tpu.dot_dimension_numbers<[1], [0], [0], [1], [0, 0, 1, 1], [], []>} : vector<8x128xf32>, vector<128x256xf32>, vector<8x256xf32> -> vector<8x256xf32>
    %13 = vector.broadcast %7 : vector<1x256xf32> to vector<8x256xf32>
    %14 = arith.addf %12, %13 : vector<8x256xf32>
    %15 = vector.extract_strided_slice %14 {offsets = [0, 0], sizes = [8, 128], strides = [1, 1]} : vector<8x256xf32> to vector<8x128xf32>
    %16 = math.tanh %15 : vector<8x128xf32>
    %cst_14 = arith.constant dense<0.000000e+00> : vector<8x128xf32>
    %17 = tpu.matmul %16, %9, %cst_14 {dimension_numbers = #tpu.dot_dimension_numbers<[1], [0], [0], [1], [0, 0, 1, 1], [], []>} : vector<8x128xf32>, vector<128x128xf32>, vector<8x128xf32> -> vector<8x128xf32>
    %18 = vector.broadcast %11 : vector<1x128xf32> to vector<8x128xf32>
    %19 = arith.addf %17, %18 : vector<8x128xf32>
    %20 = vector.extract_strided_slice %14 {offsets = [0, 128], sizes = [8, 128], strides = [1, 1]} : vector<8x256xf32> to vector<8x128xf32>
    %21 = arith.addf %19, %20 : vector<8x128xf32>
    %22 = math.tanh %21 : vector<8x128xf32>
    %c0_15 = arith.constant 0 : index
    %c0_16 = arith.constant 0 : index
    %23 = vector.load %arg10[%c0_15, %c0_16] : memref<8x128xf32, #tpu.memory_space<vmem>>, vector<8x128xf32>
    tpu.vector_store %arg10[%c0_15, %c0_16], %22 {strides = array<i32>} : memref<8x128xf32, #tpu.memory_space<vmem>>, vector<8x128xf32>,
    %c1_i32 = arith.constant 1 : i32
    %24 = arith.cmpi eq, %arg1, %c1_i32 : i32
    %25 = arith.extui %24 : i1 to i32
    %c0_i32_17 = arith.constant 0 : i32
    %26 = arith.cmpi ne, %25, %c0_i32_17 : i32
    scf.if %26 {
      %c0_18 = arith.constant 0 : index
      %c0_19 = arith.constant 0 : index
      %27 = vector.load %arg7[%c0_18, %c0_19] : memref<128x128xf32, #tpu.memory_space<vmem>>, vector<128x128xf32>
      %cst_20 = arith.constant dense<0.000000e+00> : vector<8x128xf32>
      %28 = tpu.matmul %22, %27, %cst_20 {dimension_numbers = #tpu.dot_dimension_numbers<[1], [0], [0], [1], [0, 0, 1, 1], [], []>} : vector<8x128xf32>, vector<128x128xf32>, vector<8x128xf32> -> vector<8x128xf32>
      %c0_21 = arith.constant 0 : index
      %c0_22 = arith.constant 0 : index
      %29 = vector.load %arg8[%c0_21, %c0_22] : memref<1x128xf32, #tpu.memory_space<vmem>>, vector<1x128xf32>
      %30 = vector.broadcast %29 : vector<1x128xf32> to vector<8x128xf32>
      %31 = arith.addf %28, %30 : vector<8x128xf32>
      %c0_23 = arith.constant 0 : index
      %c0_24 = arith.constant 0 : index
      %32 = vector.load %arg9[%c0_23, %c0_24] : memref<8x128xf32, #tpu.memory_space<vmem>>, vector<8x128xf32>
      tpu.vector_store %arg9[%c0_23, %c0_24], %31 {strides = array<i32>} : memref<8x128xf32, #tpu.memory_space<vmem>>, vector<8x128xf32>,
    } else {
    }
    return
  }
  func.func @transform_0(%arg0: i32, %arg1: i32) -> (i32, i32) {
    %c0_i32 = arith.constant 0 : i32
    %c0_i32_0 = arith.constant 0 : i32
    return %arg0, %c0_i32 : i32, i32
  }
  func.func @transform_1(%arg0: i32, %arg1: i32) -> (i32, i32, i32) {
    %c0_i32 = arith.constant 0 : i32
    %c0_i32_0 = arith.constant 0 : i32
    %c0_i32_1 = arith.constant 0 : i32
    return %arg1, %c0_i32, %c0_i32_0 : i32, i32, i32
  }
  func.func @transform_2(%arg0: i32, %arg1: i32) -> (i32, i32, i32) {
    %c0_i32 = arith.constant 0 : i32
    %c0_i32_0 = arith.constant 0 : i32
    %c0_i32_1 = arith.constant 0 : i32
    return %arg1, %c0_i32, %c0_i32_0 : i32, i32, i32
  }
  func.func @transform_3(%arg0: i32, %arg1: i32) -> (i32, i32, i32) {
    %c0_i32 = arith.constant 0 : i32
    %c0_i32_0 = arith.constant 0 : i32
    %c0_i32_1 = arith.constant 0 : i32
    return %arg1, %c0_i32, %c0_i32_0 : i32, i32, i32
  }
  func.func @transform_4(%arg0: i32, %arg1: i32) -> (i32, i32, i32) {
    %c0_i32 = arith.constant 0 : i32
    %c0_i32_0 = arith.constant 0 : i32
    %c0_i32_1 = arith.constant 0 : i32
    return %arg1, %c0_i32, %c0_i32_0 : i32, i32, i32
  }
  func.func @transform_5(%arg0: i32, %arg1: i32) -> (i32, i32) {
    %c0_i32 = arith.constant 0 : i32
    %c0_i32_0 = arith.constant 0 : i32
    %c0_i32_1 = arith.constant 0 : i32
    return %c0_i32, %c0_i32_0 : i32, i32
  }
  func.func @transform_6(%arg0: i32, %arg1: i32) -> (i32, i32) {
    %c0_i32 = arith.constant 0 : i32
    %c0_i32_0 = arith.constant 0 : i32
    %c0_i32_1 = arith.constant 0 : i32
    return %c0_i32, %c0_i32_0 : i32, i32
  }
  func.func @transform_7(%arg0: i32, %arg1: i32) -> (i32, i32) {
    %c0_i32 = arith.constant 0 : i32
    %c0_i32_0 = arith.constant 0 : i32
    return %arg0, %c0_i32 : i32, i32
  }
}

</mosaic_0001>

<bundles_post_ra>
// kernel: adaptive_resnet_forward.1
= control target key start
LH: loop header
LB: loop body
LE: loop exit
PB: predicated region body
PF: predicated region fallthrough
CT: control target
= control target key end

     0   :  { %s1660_s0 = inlined_call_operand.vmem [shape: f32[8,128], index: 0, kind: input, shape index: {}]   ;;  %s1661_s1 = inlined_call_operand.hbm [shape: f32[2,128,256], index: 1, kind: input, shape index: {}]   ;;  %s1662_s2 = inlined_call_operand.vmem [shape: f32[2,1,256], index: 2, kind: input, shape index: {}]   ;;  %s1663_s3 = inlined_call_operand.hbm [shape: f32[2,128,128], index: 3, kind: input, shape index: {}]   ;;  %s1664_s4 = inlined_call_operand.vmem [shape: f32[2,1,128], index: 4, kind: input, shape index: {}]   ;;  %s1665_s5 = inlined_call_operand.hbm [shape: f32[128,128], index: 5, kind: input, shape index: {}]   ;;  %s1666_s6 = inlined_call_operand.vmem [shape: f32[1,128], index: 6, kind: input, shape index: {}]   ;;  %s1667_s7 = inlined_call_operand.vmem [shape: f32[8,128], index: 7, kind: output, shape index: {}]  }
   0x1   :  { %1676 = sst [smem:[#allocation13_spill]] %s1661_s1 }
   0x2   :  { %1677 = sst [smem:[#allocation14_spill]] %s1665_s5 }
   0x3   :  { %12 = vsyncpa [#allocation4], 0 }
   0x4   :  { %14 = vsyncpa [#allocation4 + $0x1], 0 }
   0x5   :  { %15 = vsyncpa [#allocation6], 0 }
   0x6   :  { %17 = vsyncpa [#allocation6 + $0x1], 0  ;;  %s1361_s24 = smov 0   ;;  %s1363_s25 = smov 0  }
   0x7   :  { %s1365_s26 = smov 0   ;;  %s1367_s27 = smov 0  }
   0x8   :  { %s1369_s28 = smov 0   ;;  %s1371_s29 = smov 0  }
   0x9 LB: > { %s1672_s30 = sadd.s32 4294967295, %s1306_s29   ;;  %p81_p0 = scmp.ne.s32.totalorder %s1290_s25, %s1286_s24  ;;  %s1306_s29 = sphi %s1371_s29, %s23_s29   ;;  %s1302_s28 = sphi %s1369_s28, %s1699_s28   ;;  %s1298_s27 = sphi %s1367_s27, %s1698_s27   ;;  %s1294_s26 = sphi %s1365_s26, %s1697_s26   ;;  %s1290_s25 = sphi %s1363_s25, %s1696_s25   ;;  %s1286_s24 = sphi %s1361_s24, %s1695_s24  }
   0xa   : > { %p1393_p1 = scmp.eq.s32.totalorder %s1672_s30, 0  ;;  %p867_p2 = scmp.ge.s32.totalorder %s1306_s29, 1 }
   0xb   : > { %p238_p3 = scmp.lt.s32.totalorder %s1306_s29, 3  ;;  %s1308_s11 = smov [#allocation7]  }
   0xc   : > { %s1678_s8 = scalar_select %p1393_p1, 1, 0 }
   0xd   : > { %p1401_p4 = por %p1393_p1, %p81_p0  ;;  %p1405_p5 = pnand %p867_p2, %p238_p3 }
   0xe   : > { %s257_s12 = sshll.u32 %s1308_s11, 4  ;;  %s32_s14 = sadd.s32 1, %s1302_s28  ;;  %s258_s12 = int_to_ptr.vmem [resolvable:$true] %s257_s12 }
   0xf   : > { %s1679_s9 = scalar_select %p1401_p4, 1, 0 }
  0x10   : > { %s1680_s10 = scalar_select %p1405_p5, 1, 0 }
  0x11   : > { %p1083_p6 = pneg %p1405_p5  ;;  %s1682_s5 = sld [smem:[#allocation14_spill]] }
  0x13   : > { %p1413_p7 = pnand %p1083_p6, %p1393_p1 }
  0x15   : > { %p1162_p9 = pneg %p1413_p7 }
  0x17   : > { %s1160_s17 = scalar_lea.hbm %s1682_s5, 2048 }
  0x18   : > { %p1161_p8 = scmp.ne.s32.totalorder %s1682_s5, %s1160_s17  ;;  %p1167_p12 = scmp.lt.u32.totalorder %s1160_s17, %s1682_s5 }
  0x1a   : > { %p1163_p10 = pnand %p1162_p9, %p1161_p8 }
  0x1c   : > { %p1164_p11 = pneg %p1163_p10 }
  0x1e   : > { %p1169_p13 = pnand %p1167_p12, %p1164_p11 }
  0x20   : > { %1172 = shalt.err (!%p1169_p13)
}
  0x21   : > { %s1173_s22 = scalar_lea.vmem %s258_s12, 2048  ;;  %p1181_p6 = scmp.lt.s32.totalorder %s258_s12, %s258_s12 }
  0x22   : > { %p1174_p0 = scmp.ne.s32.totalorder %s258_s12, %s1173_s22  ;;  %p1182_p1 = scmp.lt.s32.totalorder %s1173_s22, %s1173_s22 }
  0x24   : > { %p1176_p2 = pnand %p1174_p0, %p1162_p9  ;;  %p1183_p4 = por %p1182_p1, %p1181_p6 }
  0x26   : > { %p1177_p3 = pneg %p1176_p2 }
  0x28   : > { %p1184_p5 = pnand %p1183_p4, %p1177_p3 }
  0x2a   : > { %1187 = shalt.err (!%p1184_p5)
}
  0x2b   : > { %s1673_s23 = smov 128   ;;  %s1674_s24 = smov 8  }
  0x2c   : > { %1086 = dma.hbm_to_vmem [thread:$0]  (!%p1413_p7), %s1682_s5, 2048, %s258_s12, [#allocation6], %s1673_s23, %s1673_s23, %s1674_s24  }
  0x2d   : > { %p33_p1 = scmp.ge.s32.totalorder %s32_s14, 2  ;;  %s68_s16 = sadd.s32 1, %s1294_s26 }
  0x2e   : > { %p75_p4 = scmp.ne.s32.totalorder %s1294_s26, %s1290_s25  ;;  %p76_p5 = scmp.eq.s32.totalorder %s1306_s29, 0 }
  0x2f   : > { %s1701_s14 = smov (%p33_p1, %s32_s14), 0  ;;  %p1095_p9 = scmp.lt.s32.totalorder %s1306_s29, 2 }
  0x30   : > { %1683 = sst [smem:[#allocation11_spill]] %s1701_s14  ;;  %p77_p8 = por %p76_p5, %p75_p4 }
  0x31   : > { %s65_s17 = ssub.s32 %s1302_s28, %s1701_s14  ;;  %s1447_s18 = sand.u32 1, %s1294_s26  }
  0x32   : > { %p66_p10 = scmp.eq.s32.totalorder %s65_s17, 0  ;;  %s871_s13 = sshll.u32 %s1447_s18, 8 }
  0x33   : > { %s889_s19 = sshll.u32 %s1302_s28, 12  ;;  %s1685_s1 = sld [smem:[#allocation13_spill]] }
  0x34   : > { %s1452_s20 = scalar_select %p66_p10, %s1294_s26, %s68_s16  }
  0x35   : > { %s278_s11 = scalar_lea.vmem [#allocation3], %s871_s13  ;;  %p1459_p7 = pnand %p1095_p9, %p77_p8 }
  0x36   : > { %1684 = sst [smem:[#allocation12_spill]] %s1452_s20  ;;  %s285_s15 = sshll.u32 %s278_s11, 4  ;;  %s1463_s15 = int_to_ptr.vmem [resolvable:$true] %s285_s15 }
  0x37   : > { %s275_s16 = scalar_lea.sflag [#allocation4], %s1447_s18  ;;  %p1190_p12 = pneg %p1459_p7 }
  0x39   : > { %s1457_s22 = scalar_lea.hbm %s1685_s1, %s889_s19  ;;  %s1193_s12 = scalar_lea.hbm %s1685_s1, 8192 }
  0x3a   : > { %s1188_s17 = scalar_lea.hbm %s1457_s22, 4096  ;;  %p1194_p2 = scmp.lt.u32.totalorder %s1457_s22, %s1685_s1 }
  0x3b   : > { %p1189_p11 = scmp.ne.s32.totalorder %s1457_s22, %s1188_s17  ;;  %p1195_p3 = scmp.lt.u32.totalorder %s1193_s12, %s1188_s17 }
  0x3c   : > { %p1197_p1 = scmp.lt.u32.totalorder %s1188_s17, %s1457_s22 }
  0x3d   : > { %p1191_p13 = pnand %p1190_p12, %p1189_p11  ;;  %p1196_p6 = por %p1195_p3, %p1194_p2 }
  0x3f   : > { %p1192_p0 = pneg %p1191_p13  ;;  %p1198_p4 = por %p1197_p1, %p1196_p6 }
  0x41   : > { %p1199_p5 = pnand %p1198_p4, %p1192_p0 }
  0x43   : > { %1202 = shalt.err (!%p1199_p5)
}
  0x44   : > { %s1203_s23 = scalar_lea.vmem %s1463_s15, 4096  ;;  %s1311_s19 = smov [#allocation3]  }
  0x45   : > { %p1204_p8 = scmp.ne.s32.totalorder %s1463_s15, %s1203_s23  ;;  %s1208_s13 = sshll.u32 %s1311_s19, 4  ;;  %s1209_s13 = int_to_ptr.vmem [resolvable:$false] %s1208_s13 }
  0x46   : > { %s1210_s21 = scalar_lea.vmem %s1209_s13, 8192  ;;  %p1211_p11 = scmp.lt.s32.totalorder %s1463_s15, %s1209_s13 }
  0x47   : > { %p1206_p9 = pnand %p1204_p8, %p1190_p12  ;;  %p1212_p13 = scmp.lt.s32.totalorder %s1210_s21, %s1203_s23 }
  0x49   : > { %p1207_p10 = pneg %p1206_p9  ;;  %p1213_p2 = por %p1212_p13, %p1211_p11 }
  0x4b   : > { %p1214_p3 = pnand %p1213_p2, %p1207_p10 }
  0x4d   : > { %1217 = shalt.err (!%p1214_p3)
}
  0x4e   : > { %s1312_s17 = smov 256   ;;  %s1313_s12 = smov 16  }
  0x4f   : > { %1090 = dma.hbm_to_vmem [thread:$0]  (!%p1459_p7), %s1457_s22, 4096, %s1463_s15, %s275_s16, %s1312_s17, %s1312_s17, %s1313_s12  }
  0x50   : > { %s302_s11 = sand.u32 1, %s1306_s29   ;;  %s874_s19 = sshll.u32 %s1447_s18, 7 }
  0x51   : > { %s890_s13 = sshll.u32 %s1302_s28, 11  ;;  %s306_s23 = scalar_lea.vmem [#allocation5], %s874_s19 }
  0x52   : > { %s313_s21 = sshll.u32 %s306_s23, 4  ;;  %s1499_s5 = scalar_lea.hbm %s1663_s3, %s890_s13  ;;  %s1501_s21 = int_to_ptr.vmem [resolvable:$true] %s313_s21 }
  0x53   : > { %s1503_s14 = scalar_lea.sflag [#allocation6], %s302_s11  ;;  %s1218_s20 = scalar_lea.hbm %s1499_s5, 2048 }
  0x54   : > { %p1219_p0 = scmp.ne.s32.totalorder %s1499_s5, %s1218_s20  ;;  %s1223_s1 = scalar_lea.hbm %s1663_s3, 4096 }
  0x55   : > { %p1224_p4 = scmp.lt.u32.totalorder %s1499_s5, %s1663_s3  ;;  %p1225_p5 = scmp.lt.u32.totalorder %s1223_s1, %s1218_s20 }
  0x56   : > { %p1221_p6 = pnand %p1219_p0, %p1190_p12  ;;  %p1227_p9 = scmp.lt.u32.totalorder %s1218_s20, %s1499_s5 }
  0x57   : > { %p1226_p8 = por %p1225_p5, %p1224_p4 }
  0x58   : > { %p1222_p1 = pneg %p1221_p6 }
  0x59   : > { %p1228_p10 = por %p1227_p9, %p1226_p8 }
  0x5b   : > { %p1229_p11 = pnand %p1228_p10, %p1222_p1 }
  0x5d   : > { %1232 = shalt.err (!%p1229_p11)
}
  0x5e   : > { %s1233_s16 = scalar_lea.vmem %s1501_s21, 2048  ;;  %s1314_s17 = smov [#allocation5]  }
  0x5f   : > { %p1234_p13 = scmp.ne.s32.totalorder %s1501_s21, %s1233_s16  ;;  %s1238_s12 = sshll.u32 %s1314_s17, 4  ;;  %s1239_s12 = int_to_ptr.vmem [resolvable:$false] %s1238_s12 }
  0x60   : > { %s1240_s11 = scalar_lea.vmem %s1239_s12, 4096  ;;  %p1241_p0 = scmp.lt.s32.totalorder %s1501_s21, %s1239_s12 }
  0x61   : > { %p1236_p2 = pnand %p1234_p13, %p1190_p12  ;;  %p1242_p6 = scmp.lt.s32.totalorder %s1240_s11, %s1233_s16 }
  0x63   : > { %p1237_p3 = pneg %p1236_p2  ;;  %p1243_p4 = por %p1242_p6, %p1241_p0 }
  0x65   : > { %p1244_p5 = pnand %p1243_p4, %p1237_p3 }
  0x67   : > { %1247 = shalt.err (!%p1244_p5)
}
  0x68   : > { %s1687_s20 = smov 8   ;;  %s1688_s19 = smov 128  }
  0x69   : > { %1093 = dma.hbm_to_vmem [thread:$0]  (!%p1459_p7), %s1499_s5, 2048, %s1501_s21, %s1503_s14, %s1688_s19, %s1688_s19, %s1687_s20  }
  0x6a   : > { %p1689_p12 = scmp.ne.s32.totalorder %s1680_s10, 0 }
  0x6b   : > { %s333_s13 = sand.u32 (!%p1689_p12), 1, %s1290_s25   ;;  %p1690_p1 = scmp.ne.s32.totalorder (!%p1689_p12), %s1679_s9, 0 }
  0x6c   : > { %331 = sbr.rel (%p1689_p12) target bundleno = 835 (0x343), region = 48  ;;  %s878_s23 = sshll.u32 (!%p1689_p12), %s333_s13, 8 }
  0x6d   : > { %s334_s18 = scalar_lea.sflag (!%p1689_p12), [#allocation4], %s333_s13  ;;  %s1535_s22 = scalar_lea.vmem (!%p1689_p12), [#allocation3], %s878_s23 }
  0x73   : > { %1273 = dma.done.wait (%p1690_p1), %s334_s18, 4096  }
  0x74   : > { %1275 = vsyncadd (%p1690_p1), %s334_s18, 4294963200  ;;  %s1691_s30 = sadd.s32 4294967295, %s1306_s29   ;;  %s879_s5 = sshll.u32 %s333_s13, 7 }
  0x75   : > { %s342_s1 = sand.u32 1, %s1691_s30   ;;  %s1543_s10 = scalar_lea.vmem [#allocation5], %s879_s5 }
  0x76   : > { %s343_s14 = scalar_lea.sflag [#allocation6], %s342_s1 }
  0x77   : > { %1277 = dma.done.wait (%p1690_p1), %s343_s14, 2048  }
  0x78   : > { %1279 = vsyncadd (%p1690_p1), %s343_s14, 4294965248  ;;  %p1692_p7 = scmp.ne.s32.totalorder %s1678_s8, 0 }
  0x7a   : > { %1281 = dma.done.wait (%p1692_p7), [#allocation6], 2048  }
  0x7b   : > { %1283 = vsyncadd (%p1692_p7), [#allocation6], 4294965248  ;;  %p400_p8 = scmp.lt.s32.totalorder %s1298_s27, 1  ;;  %p882_p9 = scmp.ne.s32.totalorder %s1298_s27, 0 }
  0x7c   : > { %v415_v0 = vld [vmem:[%s1660_s0] sm:$0xff] (!%p882_p9) }
  0x7d   : > { %s1555_s21 = scalar_select %p400_p8, %s1298_s27, 1 }
  0x7e   : > { %414 = sbr.rel (%p882_p9) target bundleno = 133 (0x85), region = 64  ;;  %416 = vst [vmem:[#allocation2] sm:$0xff] (!%p882_p9), %v415_v0 }
  0x7f   : > { %s881_s24 = sshll.u32 %s1555_s21, 1  ;;  %s406_s17 = scalar_lea.vmem %s1664_s4, %s1555_s21 }
  0x80   : > { %s1565_s11 = scalar_lea.vmem %s1662_s2, %s881_s24 }
  0x85 PF: > { %v419_v1 = vld [vmem:[%s1535_s22 + $0x8] sm:$0xff]  ;;  %v421_v2 = vld [vmem:[%s1535_s22 + $0x18] sm:$0xff]  ;;  %v418_v3 = vld [vmem:[%s1535_s22] sm:$0xff]  ;;  %v1315_v8 = vmov 0.0   ;;  %v1316_v9 = vmov 0.0|0.0   ;;  %vm1317_vm0 = vmmov 0  }
  0x86   : > { %v995_v4 = vpack.c.bf16 %v421_v2, %v419_v1  ;;  %v420_v5 = vld [vmem:[%s1535_s22 + $0x10] sm:$0xff]  ;;  %v423_v6 = vld [vmem:[%s1535_s22 + $0x28] sm:$0xff]  ;;  %v425_v7 = vld [vmem:[%s1535_s22 + $0x38] sm:$0xff]  ;;  %543 = vmatprep.mubr.f32.mxu0 %v1315_v8  ;;  %1027 = vmatprep.subr.bf16.mxu1 %v1316_v9  ;;  %p884_p10 = scmp.ne.s32.totalorder %s1298_s27, 1 }
  0x87   : > { %v997_v10 = vpack.c.bf16 %v420_v5, %v418_v3  ;;  %v999_v11 = vpack.c.bf16 %v425_v7, %v423_v6  ;;  %v422_v12 = vld [vmem:[%s1535_s22 + $0x20] sm:$0xff]  ;;  %v424_v13 = vld [vmem:[%s1535_s22 + $0x30] sm:$0xff]  ;;  %v427_v14 = vld [vmem:[%s1535_s22 + $0x48] sm:$0xff]  ;;  %957 = vmatprep.mubr.msk.f32.mxu1 %vm1317_vm0, %v1315_v8  ;;  %vm1319_vm1 = vmmov (!%p884_p10), 0  }
  0x88   : > { %996 = vmatprep.subr.bf16.mxu0 %v995_v4  ;;  %v429_v15 = vld [vmem:[%s1535_s22 + $0x58] sm:$0xff]  ;;  %v1001_v16 = vpack.c.bf16 %v424_v13, %v422_v12  ;;  %v426_v18 = vld [vmem:[%s1535_s22 + $0x40] sm:$0xff]  ;;  %v428_v19 = vld [vmem:[%s1535_s22 + $0x50] sm:$0xff] }
  0x89   : > { %998 = vmatpush1.bf16.msra.mxu0 %v997_v10  ;;  %v1003_v17 = vpack.c.bf16 %v429_v15, %v427_v14  ;;  %v431_v20 = vld [vmem:[%s1535_s22 + $0x68] sm:$0xff]  ;;  %v433_v21 = vld [vmem:[%s1535_s22 + $0x78] sm:$0xff]  ;;  %v1005_v22 = vpack.c.bf16 %v428_v19, %v426_v18  ;;  %v430_v24 = vld [vmem:[%s1535_s22 + $0x60] sm:$0xff]  ;;  %v469_v14 = vlaneseq }
  0x8a   : > { %1000 = vmatprep.subr.bf16.mxu0 %v999_v11  ;;  %v1007_v23 = vpack.c.bf16 %v433_v21, %v431_v20  ;;  %v432_v25 = vld [vmem:[%s1535_s22 + $0x70] sm:$0xff]  ;;  %v435_v26 = vld [vmem:[%s1535_s22 + $0x88] sm:$0xff]  ;;  %v437_v27 = vld [vmem:[%s1535_s22 + $0x98] sm:$0xff] }
  0x8b   : > { %v451_v28 = vld [vmem:[%s1543_s10] sm:$0xff]  ;;  %v452_v29 = vld [vmem:[%s1543_s10 + $0x8] sm:$0xff]  ;;  %v453_v30 = vld [vmem:[%s1543_s10 + $0x10] sm:$0xff]  ;;  %v1009_v31 = vpack.c.bf16 %v432_v25, %v430_v24  ;;  %v1011_v34 = vpack.c.bf16 %v437_v27, %v435_v26  ;;  %v470_v15 = vshrl.u32 %v469_v14, 7 }
  0x8c   : > { %v1028_v32 = vpack.c.bf16 %v452_v29, %v451_v28  ;;  %v454_v33 = vld [vmem:[%s1543_s10 + $0x18] sm:$0xff]  ;;  %v434_v35 = vld [vmem:[%s1535_s22 + $0x80] sm:$0xff]  ;;  %v436_v36 = vld [vmem:[%s1535_s22 + $0x90] sm:$0xff] }
  0x8d   : > { %1002 = vmatpush1.bf16.msra.mxu0 %v1001_v16  ;;  %v439_v37 = vld [vmem:[%s1535_s22 + $0xa8] sm:$0xff]  ;;  %v441_v38 = vld [vmem:[%s1535_s22 + $0xb8] sm:$0xff]  ;;  %v1031_v39 = vpack.c.bf16 %v454_v33, %v453_v30  ;;  %v455_v40 = vld [vmem:[%s1543_s10 + $0x20] sm:$0xff]  ;;  %v1013_v42 = vpack.c.bf16 %v436_v36, %v434_v35  ;;  %v471_v16 = vsub.s32 0, %v470_v15  ;;  %v1318_v33 = vmov (!%p884_p10), 0.0|0.0  }
  0x8e   : > { %1004 = vmatprep.subr.bf16.mxu0 %v1003_v17  ;;  %1029 = vmatpush3.bf16.msra.mxu1 %v1028_v32  ;;  %v456_v41 = vld [vmem:[%s1543_s10 + $0x28] sm:$0xff]  ;;  %v1015_v43 = vpack.c.bf16 %v441_v38, %v439_v37  ;;  %v438_v44 = vld [vmem:[%s1535_s22 + $0xa0] sm:$0xff]  ;;  %v440_v45 = vld [vmem:[%s1535_s22 + $0xb0] sm:$0xff]  ;;  %v1320_v36 = vmov (!%p884_p10), 0.0  }
  0x8f   : > { %1030 = vmatprep.subr.bf16.mxu1 %v1316_v9  ;;  %v443_v46 = vld [vmem:[%s1535_s22 + $0xc8] sm:$0xff]  ;;  %v445_v47 = vld [vmem:[%s1535_s22 + $0xd8] sm:$0xff]  ;;  %v1034_v48 = vpack.c.bf16 %v456_v41, %v455_v40  ;;  %v457_v49 = vld [vmem:[%s1543_s10 + $0x30] sm:$0xff]  ;;  %v1017_v51 = vpack.c.bf16 %v440_v45, %v438_v44 }
  0x90   : > { %v458_v50 = vld [vmem:[%s1543_s10 + $0x38] sm:$0xff]  ;;  %v1019_v52 = vpack.c.bf16 %v445_v47, %v443_v46  ;;  %v442_v53 = vld [vmem:[%s1535_s22 + $0xc0] sm:$0xff]  ;;  %v444_v54 = vld [vmem:[%s1535_s22 + $0xd0] sm:$0xff] }
  0x91   : > { %1006 = vmatpush1.bf16.msra.mxu0 %v1005_v22  ;;  %v447_v55 = vld [vmem:[%s1535_s22 + $0xe8] sm:$0xff]  ;;  %v449_v56 = vld [vmem:[%s1535_s22 + $0xf8] sm:$0xff]  ;;  %v1037_v57 = vpack.c.bf16 %v458_v50, %v457_v49  ;;  %v459_v58 = vld [vmem:[%s1543_s10 + $0x40] sm:$0xff]  ;;  %v1021_v60 = vpack.c.bf16 %v444_v54, %v442_v53 }
  0x92   : > { %1008 = vmatprep.subr.bf16.mxu0 %v1007_v23  ;;  %1032 = vmatpush3.bf16.msra.mxu1 %v1031_v39  ;;  %v460_v59 = vld [vmem:[%s1543_s10 + $0x48] sm:$0xff]  ;;  %v1023_v61 = vpack.c.bf16 %v449_v56, %v447_v55  ;;  %v446_v62 = vld [vmem:[%s1535_s22 + $0xe0] sm:$0xff]  ;;  %v448_v63 = vld [vmem:[%s1535_s22 + $0xf0] sm:$0xff]  ;;  %v475_v23 = vsub.s32 1, %v470_v15 }
  0x93   : > { %1033 = vmatprep.subr.bf16.mxu1 %v1316_v9  ;;  %v1040_v0 = vpack.c.bf16 %v460_v59, %v459_v58  ;;  %v1025_v1 = vpack.c.bf16 %v448_v63, %v446_v62  ;;  %v417_v2 = vld [vmem:[#allocation2] sm:$0xff]  ;;  %v461_v3 = vld [vmem:[%s1543_s10 + $0x50] sm:$0xff]  ;;  %v463_v6 = vld [vmem:[%s1543_s10 + $0x60] sm:$0xff] }
  0x94   : > { %v462_v4 = vld [vmem:[%s1543_s10 + $0x58] sm:$0xff]  ;;  %v464_v7 = vld [vmem:[%s1543_s10 + $0x68] sm:$0xff]  ;;  %v465_v11 = vld [vmem:[%s1543_s10 + $0x70] sm:$0xff] }
  0x95   : > { %1010 = vmatpush1.bf16.msra.mxu0 %v1009_v31  ;;  %v1043_v5 = vpack.c.bf16 %v462_v4, %v461_v3  ;;  %v1046_v10 = vpack.c.bf16 %v464_v7, %v463_v6  ;;  %v466_v12 = vld [vmem:[%s1543_s10 + $0x78] sm:$0xff]  ;;  %v634_v30 = vld [vmem:[#allocation7] sm:$0xff] (!%p884_p10)  ;;  %v635_v31 = vld [vmem:[#allocation7 + $0x8] sm:$0xff] (!%p884_p10) }
  0x96   : > { %1012 = vmatprep.subr.bf16.mxu0 %v1011_v34  ;;  %1035 = vmatpush3.bf16.msra.mxu1 %v1034_v48  ;;  %v1049_v13 = vpack.c.bf16 %v466_v12, %v465_v11  ;;  %v450_v17 = vld [vmem:[%s1565_s11] sm:$0x3]  ;;  %v636_v32 = vld [vmem:[#allocation7 + $0x10] sm:$0xff] (!%p884_p10)  ;;  %v1052_v34 = vpack.c.bf16 (!%p884_p10), %v635_v31, %v634_v30  ;;  %v638_v38 = vld [vmem:[#allocation7 + $0x20] sm:$0xff] (!%p884_p10) }
  0x97   : > { %1036 = vmatprep.subr.bf16.mxu1 %v1316_v9  ;;  %v472_v18 = vrot.slane %v450_v17, %v471_v16  ;;  %v476_v24 = vrot.slane %v450_v17, %v475_v23  ;;  %v883_v8 = vld [vmem:[%s406_s17] ss:$0 sm:$0xff]  ;;  %v639_v39 = vld [vmem:[#allocation7 + $0x28] sm:$0xff] (!%p884_p10)  ;;  %v640_v41 = vld [vmem:[#allocation7 + $0x30] sm:$0xff] (!%p884_p10) }
  0x98   : > { %v637_v35 = vld [vmem:[#allocation7 + $0x18] sm:$0xff] (!%p884_p10)  ;;  %v1058_v40 = vpack.c.bf16 (!%p884_p10), %v639_v39, %v638_v38  ;;  %v642_v44 = vld [vmem:[#allocation7 + $0x40] sm:$0xff] (!%p884_p10)  ;;  %v643_v45 = vld [vmem:[#allocation7 + $0x48] sm:$0xff] (!%p884_p10) }
  0x99   : > { %1014 = vmatpush1.bf16.msra.mxu0 %v1013_v42  ;;  %v1055_v37 = vpack.c.bf16 (!%p884_p10), %v637_v35, %v636_v32  ;;  %v641_v42 = vld [vmem:[#allocation7 + $0x38] sm:$0xff] (!%p884_p10)  ;;  %v1064_v46 = vpack.c.bf16 (!%p884_p10), %v643_v45, %v642_v44  ;;  %v644_v47 = vld [vmem:[#allocation7 + $0x50] sm:$0xff] (!%p884_p10)  ;;  %v646_v50 = vld [vmem:[#allocation7 + $0x60] sm:$0xff] (!%p884_p10) }
  0x9a   : > { %1016 = vmatprep.subr.bf16.mxu0 %v1015_v43  ;;  %1038 = vmatpush3.bf16.msra.mxu1 %v1037_v57  ;;  %v1061_v43 = vpack.c.bf16 (!%p884_p10), %v641_v42, %v640_v41  ;;  %v645_v48 = vld [vmem:[#allocation7 + $0x58] sm:$0xff] (!%p884_p10)  ;;  %v648_v53 = vld [vmem:[#allocation7 + $0x70] sm:$0xff] (!%p884_p10) }
  0x9b   : > { %1039 = vmatprep.subr.bf16.mxu1 %v1316_v9  ;;  %v1067_v49 = vpack.c.bf16 (!%p884_p10), %v645_v48, %v644_v47  ;;  %v649_v54 = vld [vmem:[#allocation7 + $0x78] sm:$0xff] (!%p884_p10) }
  0x9c   : > { %v1073_v55 = vpack.c.bf16 (!%p884_p10), %v649_v54, %v648_v53  ;;  %v885_v56 = vld [vmem:[%s1666_s6] ss:$0 sm:$0xff] (!%p884_p10) }
  0x9d   : > { %1018 = vmatpush1.bf16.msra.mxu0 %v1017_v51  ;;  %v647_v51 = vld [vmem:[#allocation7 + $0x68] sm:$0xff] (!%p884_p10) }
  0x9e   : > { %1020 = vmatprep.subr.bf16.mxu0 %v1019_v52  ;;  %1041 = vmatpush3.bf16.msra.mxu1 %v1040_v0  ;;  %v1070_v52 = vpack.c.bf16 (!%p884_p10), %v647_v51, %v646_v50 }
  0x9f   : > { %1042 = vmatprep.subr.bf16.mxu1 %v1316_v9 }
  0xa1   : > { %1022 = vmatpush1.bf16.msra.mxu0 %v1021_v60 }
  0xa2   : > { %1024 = vmatprep.subr.bf16.mxu0 %v1023_v61  ;;  %1044 = vmatpush3.bf16.msra.mxu1 %v1043_v5 }
  0xa3   : > { %1045 = vmatprep.subr.bf16.mxu1 %v1316_v9 }
  0xa5   : > { %1026 = vmatpush1.bf16.msra.mxu0 %v1025_v1 }
  0xa6   : > { %1047 = vmatpush3.bf16.msra.mxu1 %v1046_v10  ;;  %1051 = vmatprep.subr.bf16.mxu0 (!%p884_p10), %v1318_v33 }
  0xa7   : > { %1048 = vmatprep.subr.bf16.mxu1 %v1316_v9 }
  0xa8   : > { %544 = vmatmul.mubr.f32.vlgmr.msra.gmra.mrb[0].mxu0 %v417_v2 }
  0xa9   : > { %992 = vmatprep.mubr.msk.f32.mxu0 (!%p884_p10), %vm1319_vm1, %v1320_v36  ;;  %1053 = vmatpush3.bf16.msra.mxu0 (!%p884_p10), %v1052_v34 }
  0xaa   : > { %1050 = vmatpush3.bf16.msra.mxu1 %v1049_v13  ;;  %1054 = vmatprep.subr.bf16.mxu0 (!%p884_p10), %v1318_v33 }
  0xad   : > { %1056 = vmatpush3.bf16.msra.mxu0 (!%p884_p10), %v1055_v37 }
  0xae   : > { %1057 = vmatprep.subr.bf16.mxu0 (!%p884_p10), %v1318_v33 }
  0xb1   : > { %1059 = vmatpush3.bf16.msra.mxu0 (!%p884_p10), %v1058_v40 }
  0xb2   : > { %1060 = vmatprep.subr.bf16.mxu0 (!%p884_p10), %v1318_v33 }
  0xb5   : > { %1062 = vmatpush3.bf16.msra.mxu0 (!%p884_p10), %v1061_v43 }
  0xb6   : > { %1063 = vmatprep.subr.bf16.mxu0 (!%p884_p10), %v1318_v33 }
  0xb9   : > { %1065 = vmatpush3.bf16.msra.mxu0 (!%p884_p10), %v1064_v46 }
  0xba   : > { %1066 = vmatprep.subr.bf16.mxu0 (!%p884_p10), %v1318_v33 }
  0xbd   : > { %1068 = vmatpush3.bf16.msra.mxu0 (!%p884_p10), %v1067_v49 }
  0xbe   : > { %1069 = vmatprep.subr.bf16.mxu0 (!%p884_p10), %v1318_v33 }
  0xc1   : > { %1071 = vmatpush3.bf16.msra.mxu0 (!%p884_p10), %v1070_v52 }
  0xc2   : > { %1072 = vmatprep.subr.bf16.mxu0 (!%p884_p10), %v1318_v33 }
  0xc5   : > { %1074 = vmatpush3.bf16.msra.mxu0 (!%p884_p10), %v1073_v55 }
 0x17b   : > { %v545_v19 = vpop.f32.mrb[0].mxu0 }
 0x17c   : > { %v546_v20 = vadd.f32 %v545_v19, %v472_v18  ;;  %v547_v21 = vpop.f32.mrb[1].mxu0 }
 0x17d   : > { %v548_v25 = vadd.f32 %v547_v21, %v476_v24 }
 0x17e   : > { %1156 = vtanh.f32 %v546_v20 }
 0x188   : > { %v1157_v22 = vpop.eup %1156 }
 0x189   : > { %958 = vmatmul.mubr.f32.vlgmr.msra.gmra.mrb[0].mxu1 %v1157_v22 }
 0x25c   : > { %v623_v9 = vpop.f32.mrb[0].mxu1 }
 0x25d   : > { %v624_v26 = vadd.f32 %v883_v8, %v623_v9  ;;  %v959_v27 = vpop.f32.mrb[1].mxu1 }
 0x25f   : > { %v627_v28 = vadd.f32 %v624_v26, %v548_v25 }
 0x261   : > { %1158 = vtanh.f32 %v627_v28 }
 0x266   : > { %633 = sbr.rel (%p884_p10) target bundleno = 835 (0x343), region = 68 }
 0x26b   : > { %v1159_v29 = vpop.eup %1158 }
 0x26c   : > { %629 = vst [vmem:[#allocation2] sm:$0xff] %v1159_v29  ;;  %993 = vmatmul.mubr.f32.vlgmr.msra.gmra.mrb[0].mxu0 (!%p884_p10), %v1159_v29 }
 0x33f   : > { %v723_v57 = vpop.f32.mrb[0].mxu0 }
 0x340   : > { %v724_v58 = vadd.f32 %v885_v56, %v723_v57  ;;  %v994_v59 = vpop.f32.mrb[1].mxu0 }
 0x342   : > { %727 = vst [vmem:[%s1667_s7] sm:$0xff] %v724_v58 }
 0x343 PF: > { %s23_s29 = sadd.s32 1, %s1306_s29   ;;  %s1693_s30 = sld [smem:[#allocation12_spill]] }
 0x344   : > { %p20_p11 = scmp.ge.s32.totalorder %s23_s29, 4   ;;  %s1694_s1 = sld [smem:[#allocation11_spill]] }
 0x345   : > { %s1695_s24 = smov %s1290_s25  ;;  %s1696_s25 = smov %s1294_s26 }
 0x346   : > { %s1698_s27 = smov %s1302_s28  ;;  %22 = sbr.rel (!%p20_p11) target bundleno = 9 (0x9), region = 122 }
 0x349   : > { %s1697_s26 = smov %s1693_s30 }
 0x34a   : > { %s1699_s28 = smov %s1694_s1 }
 0x34d   :  { %747 = vsyncpa [#allocation4], 1 }
 0x34e   :  { %749 = vsyncpa [#allocation4 + $0x1], 1 }
 0x34f   :  { %750 = vsyncpa [#allocation6], 1 }
 0x350   :  { %752 = vsyncpa [#allocation6 + $0x1], 1 }

</bundles_post_ra>
